<compile_context>
chip_gen: v7x
topology: tpu7x:2x2x1
jax: 0.10.0
libtpu: 0.0.40
codegen_flags: <defaults>
</compile_context>

<pallas_src>
import jax
import jax.numpy as jnp
from jax.experimental import pallas as pl
from jax.experimental.pallas import tpu as pltpu


def _round_up(x: int, m: int) -> int:
    return ((x + m - 1) // m) * m


# ---------------------------------------------------------------------------
# Kernels
# ---------------------------------------------------------------------------
def _ffn_kernel_f32_out(x_ref, w13_ref, w2_ref, o_ref):
    # x_ref:   (tm, dim)       token tile (constant across the hidden axis)
    # w13_ref: (dim, 2*th)     packed [w1 | w3] slice for this hidden tile
    # w2_ref:  (th, dim)       down-projection slice
    # o_ref:   (tm, dim) f32   output tile == accumulator (resident across k)
    k = pl.program_id(1)

    @pl.when(k == 0)
    def _():
        o_ref[...] = jnp.zeros_like(o_ref)

    th = w2_ref.shape[0]
    x = x_ref[...]
    # Single fused up-projection on the MXU, f32 accumulation.
    h = jnp.dot(x, w13_ref[...], preferred_element_type=jnp.float32)
    h1 = h[:, :th]            # static, lane-aligned slices (th % 128 == 0)
    h3 = h[:, th:]
    # SiLU(h1) * h3 in f32 on VPU/EUP (no bf16 elementwise path needed on v5e).
    gated = (h1 * jax.nn.sigmoid(h1)) * h3
    # Partial contribution of this hidden slice, accumulated into the output block.
    o_ref[...] += jnp.dot(gated.astype(w2_ref.dtype), w2_ref[...],
                          preferred_element_type=jnp.float32)


def _ffn_kernel_acc(x_ref, w13_ref, w2_ref, o_ref, acc_ref):
    # Same as above, with a separate f32 accumulator for non-f32 output dtypes.
    k = pl.program_id(1)

    @pl.when(k == 0)
    def _():
        acc_ref[...] = jnp.zeros_like(acc_ref)

    th = w2_ref.shape[0]
    x = x_ref[...]
    h = jnp.dot(x, w13_ref[...], preferred_element_type=jnp.float32)
    h1 = h[:, :th]
    h3 = h[:, th:]
    gated = (h1 * jax.nn.sigmoid(h1)) * h3
    acc_ref[...] += jnp.dot(gated.astype(w2_ref.dtype), w2_ref[...],
                            preferred_element_type=jnp.float32)

    @pl.when(k == pl.num_programs(1) - 1)
    def _():
        o_ref[...] = acc_ref[...].astype(o_ref.dtype)


# ---------------------------------------------------------------------------
# Generation-aware tiling defaults
# ---------------------------------------------------------------------------
_GEN_CONFIG = {
    #            tm0    th0   scoped-VMEM cap
    "v5e":     (512,   512,  100 << 20),
    "v6e":     (1024,  512,  100 << 20),
    "v7x":     (512,   256,   56 << 20),   # 64 MiB/TC physical; leave headroom
    "unknown": (512,   512,   64 << 20),
}


def _tpu_generation() -> str:
    try:
        kind = jax.devices()[0].device_kind.lower()
    except Exception:
        return "unknown"
    if "v5 lite" in kind or "v5lite" in kind or "v5e" in kind:
        return "v5e"
    if "v6" in kind:
        return "v6e"
    if "7" in kind:
        return "v7x"
    return "unknown"


def _pick_th(hidden: int, th0: int) -> int:
    th = min(th0, hidden)
    if hidden % th == 0 and (th % 128 == 0 or th == hidden):
        return th
    t = (min(th0, hidden) // 128) * 128
    while t >= 128:
        if hidden % t == 0:
            return t
        t -= 128
    return hidden


# ---------------------------------------------------------------------------
# One-time weight preparation (hoisted out of the hot path).
# ---------------------------------------------------------------------------
def prepare_ffn_weights(w1_t, w3_t, w2_t, *, th, compute_dtype=jnp.bfloat16):
    """Cast to the MXU dtype and pack w1/w3 once.

    w1_t/w3_t: [dim, hidden], w2_t: [hidden, dim] (already transposed from
    nn.Linear's [out, in]).  Returns (w13 [dim, 2*hidden], w2c [hidden, dim]),
    with w13 laid out so hidden tile k occupies columns
    [k*2*th, k*2*th+th) = w1 tile k and [k*2*th+th, (k+1)*2*th) = w3 tile k.
    """
    dim, hidden = w1_t.shape
    assert hidden % th == 0, "hidden must be divisible by th"
    nk = hidden // th
    w1c = w1_t.astype(compute_dtype).reshape(dim, nk, 1, th)
    w3c = w3_t.astype(compute_dtype).reshape(dim, nk, 1, th)
    w13 = jnp.concatenate([w1c, w3c], axis=2).reshape(dim, 2 * hidden)
    return w13, w2_t.astype(compute_dtype)


# ---------------------------------------------------------------------------
# Hot-path forward
# ---------------------------------------------------------------------------
def feed_forward(x, w13, w2c, *, th, tm0=512, vmem_cap=64 << 20,
                 compute_dtype=jnp.bfloat16):
    """x: [M, dim]; w13: [dim, 2*hidden] (packed); w2c: [hidden, dim] -> [M, dim]."""
    out_dtype = x.dtype
    M, dim = x.shape
    hidden = w2c.shape[0]
    assert w2c.shape == (hidden, dim)
    assert w13.shape == (dim, 2 * hidden)
    assert hidden % th == 0

    xc = x.astype(compute_dtype) if x.dtype != compute_dtype else x

    bpe = jnp.dtype(compute_dtype).itemsize
    obe = jnp.dtype(out_dtype).itemsize
    f32_out = out_dtype == jnp.float32
    sub = 16 if compute_dtype == jnp.bfloat16 else 8

    def vmem_bytes(tm):
        b = (2 * tm * dim * bpe             # x tile (double-buffered)
             + 2 * dim * (2 * th) * bpe     # packed w1|w3 slice (double-buffered)
             + 2 * th * dim * bpe           # w2 slice (double-buffered)
             + 2 * tm * dim * obe           # output tile (double-buffered)
             + 3 * tm * th * 4)             # h / gated f32 intermediates
        if not f32_out:
            b += tm * dim * 4               # f32 accumulator scratch
        return b

    # Token tile: generation default, clamped for small M, shrunk if padding
    # waste is excessive or the working set would blow the VMEM budget.
    tm = _round_up(max(sub, min(tm0, _round_up(M, sub))), sub)
    while tm > sub and (_round_up(M, tm) - M) * 8 > 3 * _round_up(M, tm):
        tm = _round_up(max(sub, tm // 2), sub)
    while tm > sub and vmem_bytes(tm) > int(vmem_cap * 0.85):
        tm = _round_up(max(sub, tm // 2), sub)

    M_pad = _round_up(M, tm)
    if M_pad != M:
        xc = jnp.pad(xc, ((0, M_pad - M), (0, 0)))

    grid = (M_pad // tm, hidden // th)
    vmem_limit = min(max(int(vmem_bytes(tm) * 1.5), 32 << 20), vmem_cap)

    flops = 6 * M_pad * dim * hidden              # 3 matmuls, 2 flops / MAC
    bytes_accessed = int(
        M_pad * dim * (bpe + obe)                 # read x, write out
        + 3 * dim * hidden * bpe * grid[0]        # weight stream per token tile
    )

    in_specs = [
        pl.BlockSpec((tm, dim), lambda i, k: (i, 0)),      # x tile
        pl.BlockSpec((dim, 2 * th), lambda i, k: (0, k)),  # packed w1|w3 slice
        pl.BlockSpec((th, dim), lambda i, k: (k, 0)),      # w2 slice
    ]
    out_spec = pl.BlockSpec((tm, dim), lambda i, k: (i, 0))

    if f32_out:
        kernel = _ffn_kernel_f32_out
        scratch = []
    else:
        kernel = _ffn_kernel_acc
        scratch = [pltpu.VMEM((tm, dim), jnp.float32)]

    out = pl.pallas_call(
        kernel,
        out_shape=jax.ShapeDtypeStruct((M_pad, dim), out_dtype),
        grid_spec=pltpu.PrefetchScalarGridSpec(
            num_scalar_prefetch=0,
            grid=grid,
            in_specs=in_specs,
            out_specs=out_spec,
            scratch_shapes=scratch,
        ),
        compiler_params=pltpu.CompilerParams(
            # TODO(synk): on v7x (2 TCs) a hidden-axis split across cores (each
            # core streaming half the weights, f32 partials combined via CMEM)
            # would halve per-chip weight traffic; not implemented here.
            dimension_semantics=("parallel", "arbitrary"),
            vmem_limit_bytes=vmem_limit,
        ),
        cost_estimate=pl.CostEstimate(
            flops=flops,
            transcendentals=M_pad * hidden,
            bytes_accessed=bytes_accessed,
        ),
    )(xc, w13, w2c)

    return out[:M] if M_pad != M else out


def feed_forward_ref(x, w1_t, w3_t, w2_t, compute_dtype=jnp.bfloat16):
    # Matches the kernel's numerics: bf16-cast inputs/weights, f32 math,
    # gated cast to bf16 before the down-projection.
    f32 = jnp.float32
    xc = x.astype(compute_dtype).astype(f32)
    w1 = w1_t.astype(compute_dtype).astype(f32)
    w3 = w3_t.astype(compute_dtype).astype(f32)
    w2 = w2_t.astype(compute_dtype).astype(f32)
    h1 = xc @ w1
    h3 = xc @ w3
    gated = ((h1 * jax.nn.sigmoid(h1)) * h3).astype(compute_dtype).astype(f32)
    return (gated @ w2).astype(x.dtype)


if __name__ == "__main__":
    # Small shapes consistent with the module (dim -> hidden -> dim), scaled down.
    batch, seq = 2, 8
    dim, hidden = 256, 1024          # exercises 2 hidden-reduction grid steps
    M = batch * seq

    key = jax.random.PRNGKey(0)
    kx, k1, k2, k3 = jax.random.split(key, 4)

    x = jax.random.normal(kx, (batch, seq, dim), dtype=jnp.float32)
    # Deterministic "nn.Linear" weights, stored transposed ([in, out]).
    w1_t = jax.random.normal(k1, (dim, hidden), dtype=jnp.float32) * (dim ** -0.5)
    w3_t = jax.random.normal(k3, (dim, hidden), dtype=jnp.float32) * (dim ** -0.5)
    w2_t = jax.random.normal(k2, (hidden, dim), dtype=jnp.float32) * (hidden ** -0.5)

    # Generation-aware tile / VMEM defaults.
    gen = _tpu_generation()
    tm0, th0, vmem_cap = _GEN_CONFIG.get(gen, _GEN_CONFIG["unknown"])
    th = _pick_th(hidden, th0)

    # One-time weight cast + pack (hoisted out of the per-call hot path).
    w13, w2c = prepare_ffn_weights(w1_t, w3_t, w2_t, th=th)
    w13, w2c = jax.block_until_ready((w13, w2c))

    x2d = x.reshape(M, dim)
    out = feed_forward(x2d, w13, w2c, th=th, tm0=tm0, vmem_cap=vmem_cap)
    out = jax.block_until_ready(out)

    ref = feed_forward_ref(x2d, w1_t, w3_t, w2_t)
    assert out.shape == (M, dim)
    assert jnp.allclose(out, ref, atol=3e-2, rtol=3e-2), (
        "mismatch vs reference: max abs err "
        f"{float(jnp.max(jnp.abs(out - ref)))}"
    )

    # Restore [batch, seq, dim] view (glue only).
    _ = out.reshape(batch, seq, dim)
    print("KERNEL_OK")
</pallas_src>

<mosaic_0001>
module attributes {stable_mosaic.version = 11 : i64} {
  func.func @_ffn_kernel_f32_out(%arg0: i32, %arg1: i32, %arg2: memref<16x256xbf16, #tpu.memory_space<vmem>>, %arg3: memref<256x1024xbf16, #tpu.memory_space<vmem>>, %arg4: memref<512x256xbf16, #tpu.memory_space<vmem>>, %arg5: memref<16x256xf32, #tpu.memory_space<vmem>>) attributes {dimension_semantics = [#tpu.dimension_semantics<parallel>, #tpu.dimension_semantics<arbitrary>], iteration_bounds = array<i64: 1, 2>, scalar_prefetch = 0 : i64, scratch_operands = 0 : i64, tpu.core_type = #tpu.core_type<tc>, window_params = [{transform_indices = @transform_0, window_bounds = array<i64: 16, 256>}, {transform_indices = @transform_1, window_bounds = array<i64: 256, 1024>}, {transform_indices = @transform_2, window_bounds = array<i64: 512, 256>}, {transform_indices = @transform_3, window_bounds = array<i64: 16, 256>}]} {
    %c0_i32 = arith.constant 0 : i32
    %0 = arith.cmpi eq, %arg1, %c0_i32 : i32
    %1 = arith.extui %0 : i1 to i32
    %c0_i32_0 = arith.constant 0 : i32
    %2 = arith.cmpi ne, %1, %c0_i32_0 : i32
    scf.if %2 {
      %cst_12 = arith.constant 0.000000e+00 : f32
      %21 = vector.broadcast %cst_12 : f32 to vector<16x256xf32>
      %c0_13 = arith.constant 0 : index
      %c0_14 = arith.constant 0 : index
      %22 = vector.load %arg5[%c0_13, %c0_14] : memref<16x256xf32, #tpu.memory_space<vmem>>, vector<16x256xf32>
      tpu.vector_store %arg5[%c0_13, %c0_14], %21 {strides = array<i32>} : memref<16x256xf32, #tpu.memory_space<vmem>>, vector<16x256xf32>,
    } else {
    }
    %c0 = arith.constant 0 : index
    %c0_1 = arith.constant 0 : index
    %3 = vector.load %arg2[%c0, %c0_1] : memref<16x256xbf16, #tpu.memory_space<vmem>>, vector<16x256xbf16>
    %c0_2 = arith.constant 0 : index
    %c0_3 = arith.constant 0 : index
    %4 = vector.load %arg3[%c0_2, %c0_3] : memref<256x1024xbf16, #tpu.memory_space<vmem>>, vector<256x1024xbf16>
    %cst = arith.constant dense<0.000000e+00> : vector<16x1024xf32>
    %5 = tpu.matmul %3, %4, %cst {dimension_numbers = #tpu.dot_dimension_numbers<[1], [0], [0], [1], [0, 0, 1, 1], [], []>} : vector<16x256xbf16>, vector<256x1024xbf16>, vector<16x1024xf32> -> vector<16x1024xf32>
    %6 = vector.extract_strided_slice %5 {offsets = [0, 0], sizes = [16, 512], strides = [1, 1]} : vector<16x1024xf32> to vector<16x512xf32>
    %7 = vector.extract_strided_slice %5 {offsets = [0, 512], sizes = [16, 512], strides = [1, 1]} : vector<16x1024xf32> to vector<16x512xf32>
    %8 = arith.negf %6 : vector<16x512xf32>
    %9 = math.exp %8 : vector<16x512xf32>
    %cst_4 = arith.constant 1.000000e+00 : f32
    %10 = vector.broadcast %cst_4 : f32 to vector<16x512xf32>
    %11 = arith.addf %10, %9 : vector<16x512xf32>
    %12 = arith.divf %10, %11 : vector<16x512xf32>
    %13 = arith.mulf %6, %12 : vector<16x512xf32>
    %14 = arith.mulf %13, %7 : vector<16x512xf32>
    %c0_5 = arith.constant 0 : index
    %c0_6 = arith.constant 0 : index
    %15 = vector.load %arg5[%c0_5, %c0_6] : memref<16x256xf32, #tpu.memory_space<vmem>>, vector<16x256xf32>
    %16 = arith.truncf %14 : vector<16x512xf32> to vector<16x512xbf16>
    %c0_7 = arith.constant 0 : index
    %c0_8 = arith.constant 0 : index
    %17 = vector.load %arg4[%c0_7, %c0_8] : memref<512x256xbf16, #tpu.memory_space<vmem>>, vector<512x256xbf16>
    %cst_9 = arith.constant dense<0.000000e+00> : vector<16x256xf32>
    %18 = tpu.matmul %16, %17, %cst_9 {dimension_numbers = #tpu.dot_dimension_numbers<[1], [0], [0], [1], [0, 0, 1, 1], [], []>} : vector<16x512xbf16>, vector<512x256xbf16>, vector<16x256xf32> -> vector<16x256xf32>
    %19 = arith.addf %15, %18 : vector<16x256xf32>
    %c0_10 = arith.constant 0 : index
    %c0_11 = arith.constant 0 : index
    %20 = vector.load %arg5[%c0_10, %c0_11] : memref<16x256xf32, #tpu.memory_space<vmem>>, vector<16x256xf32>
    tpu.vector_store %arg5[%c0_10, %c0_11], %19 {strides = array<i32>} : memref<16x256xf32, #tpu.memory_space<vmem>>, vector<16x256xf32>,
    return
  }
  func.func @transform_0(%arg0: i32, %arg1: i32) -> (i32, i32) {
    %c0_i32 = arith.constant 0 : i32
    %c0_i32_0 = arith.constant 0 : i32
    return %arg0, %c0_i32 : i32, i32
  }
  func.func @transform_1(%arg0: i32, %arg1: i32) -> (i32, i32) {
    %c0_i32 = arith.constant 0 : i32
    %c0_i32_0 = arith.constant 0 : i32
    return %c0_i32, %arg1 : i32, i32
  }
  func.func @transform_2(%arg0: i32, %arg1: i32) -> (i32, i32) {
    %c0_i32 = arith.constant 0 : i32
    %c0_i32_0 = arith.constant 0 : i32
    return %arg1, %c0_i32 : i32, i32
  }
  func.func @transform_3(%arg0: i32, %arg1: i32) -> (i32, i32) {
    %c0_i32 = arith.constant 0 : i32
    %c0_i32_0 = arith.constant 0 : i32
    return %arg0, %c0_i32 : i32, i32
  }
}

</mosaic_0001>

<bundles_post_ra>
// kernel: tpu_custom_call.1
= control target key start
LH: loop header
LB: loop body
LE: loop exit
PB: predicated region body
PF: predicated region fallthrough
CT: control target
= control target key end

     0   :  { %8 = vsyncpa [#allocation3], 0  ;;  %s2968_s0 = inlined_call_operand.hbm [shape: bf16[16,256], index: 0, kind: input, shape index: {}]   ;;  %s2969_s1 = inlined_call_operand.hbm [shape: bf16[256,2048], index: 1, kind: input, shape index: {}]   ;;  %s2970_s2 = inlined_call_operand.hbm [shape: bf16[1024,256], index: 2, kind: input, shape index: {}]   ;;  %s2971_s3 = inlined_call_operand.hbm [shape: f32[16,256], index: 3, kind: output, shape index: {}]  }
   0x1   :  { %9 = vsyncpa [#allocation6], 0 }
   0x2   :  { %11 = vsyncpa [#allocation6 + $0x1], 0 }
   0x3   :  { %12 = vsyncpa [#allocation4], 0  ;;  %s2530_s12 = smov 0   ;;  %s2532_s13 = smov 0  }
   0x4   :  { %s2534_s14 = smov 0   ;;  %s2536_s15 = smov 0  }
   0x5   :  { %s2538_s16 = smov 0   ;;  %s2540_s17 = smov 0  }
   0x6 LB: > { %s27_s18 = sadd.s32 1, %s2492_s16  ;;  %s63_s19 = sadd.s32 1, %s2484_s14  ;;  %s2496_s17 = sphi %s2540_s17, %s18_s17   ;;  %s2492_s16 = sphi %s2538_s16, %s2993_s16   ;;  %s2488_s15 = sphi %s2536_s15, %s2992_s15   ;;  %s2484_s14 = sphi %s2534_s14, %s2991_s14   ;;  %s2480_s13 = sphi %s2532_s13, %s2990_s13   ;;  %s2476_s12 = sphi %s2530_s12, %s2989_s12  }
   0x7   : > { %p28_p0 = scmp.ge.s32.totalorder %s27_s18, 2  ;;  %p70_p1 = scmp.ne.s32.totalorder %s2484_s14, %s2480_s13 }
   0x8   : > { %p71_p2 = scmp.eq.s32.totalorder %s2496_s17, 0  ;;  %p2131_p4 = scmp.lt.s32.totalorder %s2496_s17, 2 }
   0x9   : > { %s2995_s18 = smov (%p28_p0, %s27_s18), 0  ;;  %s169_s21 = sand.u32 1, %s2496_s17  }
   0xa   : > { %p72_p3 = por %p71_p2, %p70_p1  ;;  %s60_s20 = ssub.s32 %s2492_s16, %s2995_s18 }
   0xb   : > { %p61_p5 = scmp.eq.s32.totalorder %s60_s20, 0  ;;  %s171_s22 = sand.u32 1, %s2484_s14  }
   0xc   : > { %s2100_s23 = sshll.u32 %s2492_s16, 9  ;;  %s1882_s25 = sshll.u32 %s171_s22, 10 }
   0xd   : > { %s2574_s24 = scalar_select %p61_p5, %s2484_s14, %s63_s19  }
   0xe   : > { %s2581_s28 = scalar_lea.hbm %s2969_s1, %s2100_s23  ;;  %p2583_p6 = pnand %p2131_p4, %p72_p3 }
   0xf   : > { %s173_s30 = scalar_lea.vmem [#allocation5], %s1882_s25  ;;  %s2589_s5 = scalar_lea.sflag [#allocation6], %s169_s21 }
  0x10   : > { %s2978_s29 = scalar_select %p2583_p6, 1, 0 }
  0x11   : > { %s180_s4 = sshll.u32 %s173_s30, 4  ;;  %s2324_s6 = scalar_lea.hbm %s2581_s28, 16384  ;;  %s2587_s4 = int_to_ptr.vmem [resolvable:$true] %s180_s4 }
  0x12   : > { %p2325_p7 = scmp.ne.s32.totalorder %s2581_s28, %s2324_s6  ;;  %p2973_p8 = pneg %p2583_p6 }
  0x13   : > { %s2329_s9 = scalar_lea.hbm %s2969_s1, 32768  ;;  %p2330_p11 = scmp.lt.u32.totalorder %s2581_s28, %s2969_s1 }
  0x14   : > { %p2327_p9 = pnand %p2973_p8, %p2325_p7  ;;  %p2331_p12 = scmp.lt.u32.totalorder %s2329_s9, %s2324_s6 }
  0x15   : > { %p2333_p0 = scmp.lt.u32.totalorder %s2324_s6, %s2581_s28 }
  0x16   : > { %p2328_p10 = pneg %p2327_p9  ;;  %p2332_p13 = por %p2331_p12, %p2330_p11 }
  0x18   : > { %p2334_p1 = por %p2333_p0, %p2332_p13 }
  0x1a   : > { %p2335_p2 = pnand %p2334_p1, %p2328_p10 }
  0x1c   : > { %2338 = shalt.err (!%p2335_p2)
}
  0x1d   : > { %s2339_s19 = scalar_lea.vmem %s2587_s4, 16384  ;;  %s2498_s20 = smov [#allocation5]  }
  0x1e   : > { %p2340_p3 = scmp.ne.s32.totalorder %s2587_s4, %s2339_s19  ;;  %s2344_s21 = sshll.u32 %s2498_s20, 4  ;;  %s2345_s21 = int_to_ptr.vmem [resolvable:$false] %s2344_s21 }
  0x1f   : > { %s2346_s23 = scalar_lea.vmem %s2345_s21, 32768  ;;  %p2347_p7 = scmp.lt.s32.totalorder %s2587_s4, %s2345_s21 }
  0x20   : > { %p2342_p4 = pnand %p2340_p3, %p2973_p8  ;;  %p2348_p9 = scmp.lt.s32.totalorder %s2346_s23, %s2339_s19 }
  0x22   : > { %p2343_p5 = pneg %p2342_p4  ;;  %p2349_p11 = por %p2348_p9, %p2347_p7 }
  0x24   : > { %p2350_p12 = pnand %p2349_p11, %p2343_p5 }
  0x26   : > { %2353 = shalt.err (!%p2350_p12)
}
  0x27   : > { %s2499_s25 = smov 1024   ;;  %s2500_s26 = smov 512  }
  0x28   : > { %s2501_s27 = smov 32   ;;  %s2618_s30 = sadd.s32 4294967295, %s2496_s17  }
  0x29   : > { %2126 = dma.hbm_to_vmem [thread:$0]  (!%p2583_p6), %s2581_s28, 16384, %s2587_s4, %s2589_s5, %s2499_s25, %s2500_s26, %s2501_s27  }
  0x2a   : > { %p76_p10 = scmp.ne.s32.totalorder %s2480_s13, %s2476_s12  ;;  %p2972_p13 = scmp.eq.s32.totalorder %s2618_s30, 0 }
  0x2b   : > { %p1879_p0 = scmp.ge.s32.totalorder %s2496_s17, 1  ;;  %p139_p1 = scmp.lt.s32.totalorder %s2496_s17, 3 }
  0x2c   : > { %p2627_p2 = por %p2972_p13, %p76_p10  ;;  %s2502_s28 = smov [#allocation2]  }
  0x2d   : > { %p2631_p3 = pnand %p1879_p0, %p139_p1  ;;  %s155_s4 = sshll.u32 %s2502_s28, 4  ;;  %s2635_s4 = int_to_ptr.vmem [resolvable:$true] %s155_s4 }
  0x2e   : > { %s2979_s6 = scalar_select %p2627_p2, 1, 0 }
  0x2f   : > { %s2980_s7 = scalar_select %p2631_p3, 1, 0 }
  0x30   : > { %p2119_p4 = pneg %p2631_p3  ;;  %s1885_s12 = sshll.u32 %s171_s22, 9 }
  0x31   : > { %s2102_s8 = sshll.u32 %s2492_s16, 13  ;;  %s194_s20 = scalar_lea.vmem [#allocation7], %s1885_s12 }
  0x32   : > { %p2644_p5 = pnand %p2119_p4, %p2972_p13  ;;  %s2651_s19 = scalar_lea.hbm %s2970_s2, %s2102_s8 }
  0x33   : > { %s202_s21 = sshll.u32 %s194_s20, 4  ;;  %s2354_s22 = scalar_lea.hbm %s2968_s0, 256  ;;  %s2653_s21 = int_to_ptr.vmem [resolvable:$true] %s202_s21 }
  0x34   : > { %p2355_p7 = scmp.ne.s32.totalorder %s2968_s0, %s2354_s22  ;;  %p2356_p9 = pneg %p2644_p5 }
  0x35   : > { %p2361_p10 = scmp.lt.u32.totalorder %s2354_s22, %s2968_s0 }
  0x36   : > { %p2357_p11 = pnand %p2356_p9, %p2355_p7 }
  0x38   : > { %p2358_p12 = pneg %p2357_p11 }
  0x3a   : > { %p2363_p0 = pnand %p2361_p10, %p2358_p12 }
  0x3c   : > { %2366 = shalt.err (!%p2363_p0)
}
  0x3d   : > { %s2367_s12 = scalar_lea.vmem %s2635_s4, 256  ;;  %p2375_p8 = scmp.lt.s32.totalorder %s2635_s4, %s2635_s4 }
  0x3e   : > { %p2368_p1 = scmp.ne.s32.totalorder %s2635_s4, %s2367_s12  ;;  %p2376_p2 = scmp.lt.s32.totalorder %s2367_s12, %s2367_s12 }
  0x40   : > { %p2370_p4 = pnand %p2368_p1, %p2356_p9  ;;  %p2377_p3 = por %p2376_p2, %p2375_p8 }
  0x42   : > { %p2371_p13 = pneg %p2370_p4 }
  0x44   : > { %p2378_p6 = pnand %p2377_p3, %p2371_p13 }
  0x46   : > { %2381 = shalt.err (!%p2378_p6)
}
  0x47   : > { %s2503_s8 = smov 128   ;;  %s2504_s11 = smov 8  }
  0x48   : > { %2122 = dma.hbm_to_vmem [thread:$0]  (!%p2644_p5), %s2968_s0, 256, %s2635_s4, [#allocation3], %s2503_s8, %s2503_s8, %s2504_s11  }
  0x49   : > { %s2382_s25 = scalar_lea.hbm %s2651_s19, 8192  ;;  %p2982_p6 = scmp.ne.s32.totalorder %s2978_s29, 0 }
  0x4a   : > { %p2383_p8 = scmp.ne.s32.totalorder %s2651_s19, %s2382_s25  ;;  %s2387_s27 = scalar_lea.hbm %s2970_s2, 16384 }
  0x4b   : > { %p2983_p13 = pneg %p2982_p6  ;;  %p2388_p7 = scmp.lt.u32.totalorder %s2651_s19, %s2970_s2 }
  0x4c   : > { %p2389_p9 = scmp.lt.u32.totalorder %s2387_s27, %s2382_s25  ;;  %p2391_p12 = scmp.lt.u32.totalorder %s2382_s25, %s2651_s19 }
  0x4d   : > { %p2385_p2 = pnand %p2383_p8, %p2983_p13 }
  0x4e   : > { %p2390_p11 = por %p2389_p9, %p2388_p7 }
  0x4f   : > { %p2386_p3 = pneg %p2385_p2 }
  0x50   : > { %p2392_p10 = por %p2391_p12, %p2390_p11 }
  0x52   : > { %p2393_p0 = pnand %p2392_p10, %p2386_p3 }
  0x54   : > { %2396 = shalt.err (!%p2393_p0)
}
  0x55   : > { %s2397_s4 = scalar_lea.vmem %s2653_s21, 8192  ;;  %p2984_p1 = pmov %p2983_p13 }
  0x56   : > { %p2398_p5 = scmp.ne.s32.totalorder %s2653_s21, %s2397_s4  ;;  %s2505_s9 = smov [#allocation7]  }
  0x57   : > { %s2402_s12 = sshll.u32 %s2505_s9, 4  ;;  %s2403_s12 = int_to_ptr.vmem [resolvable:$false] %s2402_s12 }
  0x58   : > { %p2400_p4 = pnand %p2398_p5, %p2984_p1  ;;  %s2404_s20 = scalar_lea.vmem %s2403_s12, 16384 }
  0x59   : > { %p2405_p13 = scmp.lt.s32.totalorder %s2653_s21, %s2403_s12  ;;  %p2406_p2 = scmp.lt.s32.totalorder %s2404_s20, %s2397_s4 }
  0x5a   : > { %p2401_p8 = pneg %p2400_p4 }
  0x5b   : > { %p2407_p7 = por %p2406_p2, %p2405_p13 }
  0x5d   : > { %p2408_p9 = pnand %p2407_p7, %p2401_p8 }
  0x5f   : > { %2411 = shalt.err (!%p2408_p9)
}
  0x60   : > { %2129 = dma.hbm_to_vmem [thread:$0]  (!%p2982_p6), %s2651_s19, 8192, %s2653_s21, %s2589_s5, %s2503_s8, %s2503_s8, %s2504_s11  }
  0x61   : > { %p2985_p3 = scmp.ne.s32.totalorder %s2980_s7, 0 }
  0x62   : > { %p2986_p11 = scmp.eq.s32.totalorder (!%p2985_p3), %s2618_s30, 0 }
  0x63   : > { %214 = sbr.rel (%p2985_p3) target bundleno = 770 (0x302), region = 32 }
  0x6a   : > { %2463 = dma.done.wait (%p2986_p11), [#allocation3], 256   ;;  %p2987_p12 = pmov %p2986_p11 }
  0x6b   : > { %s220_s29 = sand.u32 1, %s2618_s30   ;;  %s222_s23 = sand.u32 1, %s2480_s13  }
  0x6c   : > { %2465 = vsyncadd (%p2987_p12), [#allocation3], 4294967040  ;;  %s1891_s25 = sshll.u32 %s222_s23, 10  ;;  %s221_s22 = scalar_lea.sflag [#allocation6], %s220_s29 }
  0x6d   : > { %s2714_s26 = scalar_lea.vmem [#allocation5], %s1891_s25  ;;  %p2988_p10 = scmp.ne.s32.totalorder %s2979_s6, 0 }
  0x6f   : > { %2467 = dma.done.wait (%p2988_p10), %s221_s22, 24576  }
  0x70   : > { %2469 = vsyncadd (%p2988_p10), %s221_s22, 4294942720  ;;  %s1892_s5 = sshll.u32 %s222_s23, 9  ;;  %p1893_p6 = scmp.ne.s32.totalorder %s2488_s15, 0 }
  0x71   : > { %s2720_s7 = scalar_lea.vmem [#allocation7], %s1892_s5  ;;  %v2506_v0 = vmov (!%p1893_p6), 0.0  }
  0x72   : > { %263 = sbr.rel (%p1893_p6) target bundleno = 121 (0x79), region = 48  ;;  %264 = vst [vmem:[#allocation8] sm:$0xff] (!%p1893_p6), %v2506_v0  ;;  %265 = vst [vmem:[#allocation8 + $0x8] sm:$0xff] (!%p1893_p6), %v2506_v0 }
  0x73   : > { %266 = vst [vmem:[#allocation8 + $0x10] sm:$0xff] (!%p1893_p6), %v2506_v0  ;;  %267 = vst [vmem:[#allocation8 + $0x18] sm:$0xff] (!%p1893_p6), %v2506_v0 }
  0x79 PF: > { %v270_v1 = vld [vmem:[%s2714_s26] sm:$0xff]  ;;  %v272_v12 = vld [vmem:[%s2714_s26 + $0x10] sm:$0xff]  ;;  %s2507_s15 = smov [#allocation8]   ;;  %p2133_p0 = scmp.eq.s32.totalorder %s2618_s30, 1 }
  0x7a   : > { %v274_v2 = vld [vmem:[%s2714_s26 + $0x20] sm:$0xff]  ;;  %v276_v13 = vld [vmem:[%s2714_s26 + $0x30] sm:$0xff]  ;;  %s1780_s6 = sshll.u32 %s2507_s15, 4  ;;  %s1781_s6 = int_to_ptr.vmem [resolvable:$true] %s1780_s6 }
  0x7b   : > { %v278_v3 = vld [vmem:[%s2714_s26 + $0x40] sm:$0xff]  ;;  %v1897_v4 = vcombine.high %v270_v1, %v274_v2  ;;  %v1896_v5 = vcombine.low %v270_v1, %v274_v2  ;;  %v1901_v16 = vcombine.high %v272_v12, %v276_v13  ;;  %v1900_v17 = vcombine.low %v272_v12, %v276_v13  ;;  %v280_v18 = vld [vmem:[%s2714_s26 + $0x50] sm:$0xff]  ;;  %s2412_s19 = scalar_lea.vmem %s1781_s6, 512  ;;  %p2419_p8 = scmp.lt.s32.totalorder %s1781_s6, %s1781_s6 }
  0x7c   : > { %v282_v6 = vld [vmem:[%s2714_s26 + $0x60] sm:$0xff]  ;;  %v284_v19 = vld [vmem:[%s2714_s26 + $0x70] sm:$0xff]  ;;  %p2413_p5 = scmp.ne.s32.totalorder %s1781_s6, %s2412_s19  ;;  %p2420_p13 = scmp.lt.s32.totalorder %s2412_s19, %s2412_s19 }
  0x7d   : > { %v1905_v7 = vcombine.high %v278_v3, %v282_v6  ;;  %v286_v8 = vld [vmem:[%s2714_s26 + $0x80] sm:$0xff]  ;;  %1048 = vmatprep.subr.bf16.mxu1 %v1897_v4  ;;  %v1904_v10 = vcombine.low %v278_v3, %v282_v6  ;;  %1134 = vmatprep.subr.bf16.mxu0 %v1901_v16  ;;  %v1909_v21 = vcombine.high %v280_v18, %v284_v19  ;;  %v288_v22 = vld [vmem:[%s2714_s26 + $0x90] sm:$0xff] }
  0x7e   : > { %v290_v9 = vld [vmem:[%s2714_s26 + $0xa0] sm:$0xff]  ;;  %1049 = vmatpush1.bf16.msra.mxu1 %v1896_v5  ;;  %v292_v23 = vld [vmem:[%s2714_s26 + $0xb0] sm:$0xff]  ;;  %1135 = vmatpush1.bf16.msra.mxu0 %v1900_v17  ;;  %v1908_v25 = vcombine.low %v280_v18, %v284_v19  ;;  %p2414_p1 = pnand %p2413_p5, %p2133_p0  ;;  %p2421_p2 = por %p2420_p13, %p2419_p8 }
  0x7f   : > { %1050 = vmatprep.subr.bf16.mxu1 %v1905_v7  ;;  %v1913_v11 = vcombine.high %v286_v8, %v290_v9  ;;  %v294_v14 = vld [vmem:[%s2714_s26 + $0xc0] sm:$0xff]  ;;  %v1912_v20 = vcombine.low %v286_v8, %v290_v9  ;;  %1136 = vmatprep.subr.bf16.mxu0 %v1909_v21  ;;  %v1917_v28 = vcombine.high %v288_v22, %v292_v23  ;;  %v296_v29 = vld [vmem:[%s2714_s26 + $0xd0] sm:$0xff] }
  0x80   : > { %v298_v15 = vld [vmem:[%s2714_s26 + $0xe0] sm:$0xff]  ;;  %v300_v30 = vld [vmem:[%s2714_s26 + $0xf0] sm:$0xff]  ;;  %v1916_v33 = vcombine.low %v288_v22, %v292_v23  ;;  %p2415_p4 = pneg %p2414_p1 }
  0x81   : > { %v1921_v24 = vcombine.high %v294_v14, %v298_v15  ;;  %v302_v26 = vld [vmem:[%s2714_s26 + $0x100] sm:$0xff]  ;;  %v1920_v31 = vcombine.low %v294_v14, %v298_v15  ;;  %v1925_v36 = vcombine.high %v296_v29, %v300_v30  ;;  %v304_v37 = vld [vmem:[%s2714_s26 + $0x110] sm:$0xff]  ;;  %v1924_v41 = vcombine.low %v296_v29, %v300_v30 }
  0x82   : > { %1051 = vmatpush1.bf16.msra.mxu1 %v1904_v10  ;;  %v306_v27 = vld [vmem:[%s2714_s26 + $0x120] sm:$0xff]  ;;  %1137 = vmatpush1.bf16.msra.mxu0 %v1908_v25  ;;  %v308_v38 = vld [vmem:[%s2714_s26 + $0x130] sm:$0xff]  ;;  %p2422_p7 = pnand %p2421_p2, %p2415_p4 }
  0x83   : > { %1052 = vmatprep.subr.bf16.mxu1 %v1913_v11  ;;  %v1929_v32 = vcombine.high %v302_v26, %v306_v27  ;;  %v310_v34 = vld [vmem:[%s2714_s26 + $0x140] sm:$0xff]  ;;  %1138 = vmatprep.subr.bf16.mxu0 %v1917_v28  ;;  %v1928_v39 = vcombine.low %v302_v26, %v306_v27  ;;  %v2745_v42 = vld [vmem:[#allocation2 + $0x4] ss:$8 sps:$4 sm:$0xff]   ;;  %v1933_v45 = vcombine.high %v304_v37, %v308_v38 }
  0x84   : > { %v314_v35 = vld [vmem:[%s2714_s26 + $0x160] sm:$0xff]  ;;  %v312_v46 = vld [vmem:[%s2714_s26 + $0x150] sm:$0xff]  ;;  %1080 = vmatprep.mubr.bf16.mxu1 %v2745_v42  ;;  %1166 = vmatprep.mubr.bf16.mxu0 %v2745_v42  ;;  %v1932_v50 = vcombine.low %v304_v37, %v308_v38 }
  0x85   : > { %v1937_v40 = vcombine.high %v310_v34, %v314_v35  ;;  %v318_v43 = vld [vmem:[%s2714_s26 + $0x180] sm:$0xff]  ;;  %v316_v47 = vld [vmem:[%s2714_s26 + $0x170] sm:$0xff]  ;;  %v1936_v48 = vcombine.low %v310_v34, %v314_v35 }
  0x86   : > { %1053 = vmatpush1.bf16.msra.mxu1 %v1912_v20  ;;  %1139 = vmatpush1.bf16.msra.mxu0 %v1916_v33  ;;  %v322_v44 = vld [vmem:[%s2714_s26 + $0x1a0] sm:$0xff]  ;;  %v1941_v53 = vcombine.high %v312_v46, %v316_v47  ;;  %v320_v54 = vld [vmem:[%s2714_s26 + $0x190] sm:$0xff]  ;;  %v1940_v58 = vcombine.low %v312_v46, %v316_v47 }
  0x87   : > { %1054 = vmatprep.subr.bf16.mxu1 %v1921_v24  ;;  %1140 = vmatprep.subr.bf16.mxu0 %v1925_v36  ;;  %v1945_v49 = vcombine.high %v318_v43, %v322_v44  ;;  %v326_v51 = vld [vmem:[%s2714_s26 + $0x1c0] sm:$0xff]  ;;  %v324_v55 = vld [vmem:[%s2714_s26 + $0x1b0] sm:$0xff]  ;;  %v1944_v56 = vcombine.low %v318_v43, %v322_v44 }
  0x88   : > { %v330_v52 = vld [vmem:[%s2714_s26 + $0x1e0] sm:$0xff]  ;;  %v1949_v61 = vcombine.high %v320_v54, %v324_v55  ;;  %v328_v62 = vld [vmem:[%s2714_s26 + $0x1d0] sm:$0xff]  ;;  %v1948_v2 = vcombine.low %v320_v54, %v324_v55 }
  0x89   : > { %v1953_v57 = vcombine.high %v326_v51, %v330_v52  ;;  %v334_v59 = vld [vmem:[%s2714_s26 + $0x200] sm:$0xff]  ;;  %v332_v63 = vld [vmem:[%s2714_s26 + $0x1f0] sm:$0xff]  ;;  %v1952_v0 = vcombine.low %v326_v51, %v330_v52 }
  0x8a   : > { %1055 = vmatpush1.bf16.msra.mxu1 %v1920_v31  ;;  %1141 = vmatpush1.bf16.msra.mxu0 %v1924_v41  ;;  %v338_v60 = vld [vmem:[%s2714_s26 + $0x220] sm:$0xff]  ;;  %v1957_v5 = vcombine.high %v328_v62, %v332_v63  ;;  %v336_v6 = vld [vmem:[%s2714_s26 + $0x210] sm:$0xff]  ;;  %v1956_v10 = vcombine.low %v328_v62, %v332_v63 }
  0x8b   : > { %1056 = vmatprep.subr.bf16.mxu1 %v1929_v32  ;;  %1142 = vmatprep.subr.bf16.mxu0 %v1933_v45  ;;  %v1961_v1 = vcombine.high %v334_v59, %v338_v60  ;;  %v342_v3 = vld [vmem:[%s2714_s26 + $0x240] sm:$0xff]  ;;  %v340_v7 = vld [vmem:[%s2714_s26 + $0x230] sm:$0xff]  ;;  %v1960_v8 = vcombine.low %v334_v59, %v338_v60  ;;  %v275_v59 = vld [vmem:[%s2714_s26 + $0x28] sm:$0xff] }
  0x8c   : > { %v346_v4 = vld [vmem:[%s2714_s26 + $0x260] sm:$0xff]  ;;  %v1965_v13 = vcombine.high %v336_v6, %v340_v7  ;;  %v344_v14 = vld [vmem:[%s2714_s26 + $0x250] sm:$0xff]  ;;  %v1964_v18 = vcombine.low %v336_v6, %v340_v7 }
  0x8d   : > { %v1969_v9 = vcombine.high %v342_v3, %v346_v4  ;;  %v350_v11 = vld [vmem:[%s2714_s26 + $0x280] sm:$0xff]  ;;  %v348_v15 = vld [vmem:[%s2714_s26 + $0x270] sm:$0xff]  ;;  %v1968_v16 = vcombine.low %v342_v3, %v346_v4  ;;  %v283_v3 = vld [vmem:[%s2714_s26 + $0x68] sm:$0xff] }
  0x8e   : > { %1057 = vmatpush1.bf16.msra.mxu1 %v1928_v39  ;;  %1143 = vmatpush1.bf16.msra.mxu0 %v1932_v50  ;;  %v354_v12 = vld [vmem:[%s2714_s26 + $0x2a0] sm:$0xff]  ;;  %v1973_v21 = vcombine.high %v344_v14, %v348_v15  ;;  %v352_v22 = vld [vmem:[%s2714_s26 + $0x290] sm:$0xff]  ;;  %v1972_v28 = vcombine.low %v344_v14, %v348_v15 }
  0x8f   : > { %1058 = vmatprep.subr.bf16.mxu1 %v1937_v40  ;;  %1144 = vmatprep.subr.bf16.mxu0 %v1941_v53  ;;  %v1977_v17 = vcombine.high %v350_v11, %v354_v12  ;;  %v358_v19 = vld [vmem:[%s2714_s26 + $0x2c0] sm:$0xff]  ;;  %v356_v23 = vld [vmem:[%s2714_s26 + $0x2b0] sm:$0xff]  ;;  %v1976_v24 = vcombine.low %v350_v11, %v354_v12  ;;  %v287_v11 = vld [vmem:[%s2714_s26 + $0x88] sm:$0xff] }
  0x90   : > { %v362_v20 = vld [vmem:[%s2714_s26 + $0x2e0] sm:$0xff]  ;;  %v360_v29 = vld [vmem:[%s2714_s26 + $0x2d0] sm:$0xff]  ;;  %v1981_v31 = vcombine.high %v352_v22, %v356_v23  ;;  %v1980_v36 = vcombine.low %v352_v22, %v356_v23  ;;  %v291_v12 = vld [vmem:[%s2714_s26 + $0xa8] sm:$0xff] }
  0x91   : > { %v366_v25 = vld [vmem:[%s2714_s26 + $0x300] sm:$0xff]  ;;  %v1985_v27 = vcombine.high %v358_v19, %v362_v20  ;;  %v364_v30 = vld [vmem:[%s2714_s26 + $0x2f0] sm:$0xff]  ;;  %v1984_v32 = vcombine.low %v358_v19, %v362_v20  ;;  %v1915_v15 = vcombine.high %v287_v11, %v291_v12  ;;  %v1914_v20 = vcombine.low %v287_v11, %v291_v12  ;;  %v303_v23 = vld [vmem:[%s2714_s26 + $0x108] sm:$0xff] }
  0x92   : > { %1059 = vmatpush1.bf16.msra.mxu1 %v1936_v48  ;;  %1145 = vmatpush1.bf16.msra.mxu0 %v1940_v58  ;;  %v370_v26 = vld [vmem:[%s2714_s26 + $0x320] sm:$0xff]  ;;  %v368_v37 = vld [vmem:[%s2714_s26 + $0x310] sm:$0xff]  ;;  %v1989_v39 = vcombine.high %v360_v29, %v364_v30  ;;  %v1988_v45 = vcombine.low %v360_v29, %v364_v30  ;;  %v271_v58 = vld [vmem:[%s2714_s26 + $0x8] sm:$0xff] }
  0x93   : > { %1060 = vmatprep.subr.bf16.mxu1 %v1945_v49  ;;  %1146 = vmatprep.subr.bf16.mxu0 %v1949_v61  ;;  %v374_v33 = vld [vmem:[%s2714_s26 + $0x340] sm:$0xff]  ;;  %v1993_v35 = vcombine.high %v366_v25, %v370_v26  ;;  %v372_v38 = vld [vmem:[%s2714_s26 + $0x330] sm:$0xff]  ;;  %v1992_v40 = vcombine.low %v366_v25, %v370_v26  ;;  %v311_v29 = vld [vmem:[%s2714_s26 + $0x148] sm:$0xff] }
  0x94   : > { %v378_v34 = vld [vmem:[%s2714_s26 + $0x360] sm:$0xff]  ;;  %v376_v46 = vld [vmem:[%s2714_s26 + $0x350] sm:$0xff]  ;;  %v1997_v48 = vcombine.high %v368_v37, %v372_v38  ;;  %v1996_v53 = vcombine.low %v368_v37, %v372_v38  ;;  %v315_v30 = vld [vmem:[%s2714_s26 + $0x168] sm:$0xff] }
  0x95   : > { %v382_v41 = vld [vmem:[%s2714_s26 + $0x380] sm:$0xff]  ;;  %v2001_v44 = vcombine.high %v374_v33, %v378_v34  ;;  %v380_v47 = vld [vmem:[%s2714_s26 + $0x370] sm:$0xff]  ;;  %v2000_v49 = vcombine.low %v374_v33, %v378_v34  ;;  %v1939_v33 = vcombine.high %v311_v29, %v315_v30  ;;  %v1938_v38 = vcombine.low %v311_v29, %v315_v30  ;;  %v383_v11 = vld [vmem:[%s2714_s26 + $0x388] sm:$0xff] }
  0x96   : > { %1061 = vmatpush1.bf16.msra.mxu1 %v1944_v56  ;;  %1147 = vmatpush1.bf16.msra.mxu0 %v1948_v2  ;;  %v386_v43 = vld [vmem:[%s2714_s26 + $0x3a0] sm:$0xff]  ;;  %v384_v54 = vld [vmem:[%s2714_s26 + $0x390] sm:$0xff]  ;;  %v2005_v56 = vcombine.high %v376_v46, %v380_v47  ;;  %v2004_v61 = vcombine.low %v376_v46, %v380_v47  ;;  %v279_v2 = vld [vmem:[%s2714_s26 + $0x48] sm:$0xff] }
  0x97   : > { %1062 = vmatprep.subr.bf16.mxu1 %v1953_v57  ;;  %1148 = vmatprep.subr.bf16.mxu0 %v1957_v5  ;;  %v390_v50 = vld [vmem:[%s2714_s26 + $0x3c0] sm:$0xff]  ;;  %v2009_v52 = vcombine.high %v382_v41, %v386_v43  ;;  %v388_v55 = vld [vmem:[%s2714_s26 + $0x3b0] sm:$0xff]  ;;  %v2008_v57 = vcombine.low %v382_v41, %v386_v43  ;;  %v1899_v5 = vcombine.high %v271_v58, %v275_v59  ;;  %v327_v41 = vld [vmem:[%s2714_s26 + $0x1c8] sm:$0xff] }
  0x98   : > { %v394_v51 = vld [vmem:[%s2714_s26 + $0x3e0] sm:$0xff]  ;;  %v392_v62 = vld [vmem:[%s2714_s26 + $0x3d0] sm:$0xff]  ;;  %v2012_v6 = vcombine.low %v384_v54, %v388_v55  ;;  %v1906_v14 = vcombine.low %v279_v2, %v283_v3  ;;  %v331_v43 = vld [vmem:[%s2714_s26 + $0x1e8] sm:$0xff] }
  0x99   : > { %v2017_v60 = vcombine.high %v390_v50, %v394_v51  ;;  %v396_v63 = vld [vmem:[%s2714_s26 + $0x3f0] sm:$0xff]  ;;  %v2204_v25 = vld [vmem:[%s2720_s7 + $0x24] ss:$8 sps:$4 sm:$0xff]   ;;  %v1955_v46 = vcombine.high %v327_v41, %v331_v43 }
  0x9a   : > { %1063 = vmatpush1.bf16.msra.mxu1 %v1952_v0  ;;  %1149 = vmatpush1.bf16.msra.mxu0 %v1956_v10  ;;  %v2013_v0 = vcombine.high %v384_v54, %v388_v55  ;;  %v2795_v4 = vld [vmem:[#allocation2] ss:$8 sps:$4 sm:$0xff]   ;;  %v2021_v7 = vcombine.high %v392_v62, %v396_v63  ;;  %v2020_v10 = vcombine.low %v392_v62, %v396_v63  ;;  %v2201_v19 = vld [vmem:[%s2720_s7 + $0x14] ss:$8 sps:$4 sm:$0xff]   ;;  %v2210_v37 = vld [vmem:[%s2720_s7 + $0x44] ss:$8 sps:$4 sm:$0xff]  }
  0x9b   : > { %1064 = vmatprep.subr.bf16.mxu1 %v1961_v1  ;;  %1150 = vmatprep.subr.bf16.mxu0 %v1965_v13  ;;  %v2016_v1 = vcombine.low %v390_v50, %v394_v51  ;;  %v2198_v13 = vld [vmem:[%s2720_s7 + $0x4] ss:$8 sps:$4 sm:$0xff]   ;;  %v2199_v22 = vld [vmem:[%s2720_s7 + $0x10] ss:$8 sps:$4 sm:$0xff]   ;;  %v1954_v51 = vcombine.low %v327_v41, %v331_v43 }
  0x9c   : > { %v2205_v34 = vld [vmem:[%s2720_s7 + $0x30] ss:$8 sps:$4 sm:$0xff]   ;;  %v2216_v50 = vld [vmem:[%s2720_s7 + $0x64] ss:$8 sps:$4 sm:$0xff]  }
  0x9d   : > { %v2211_v47 = vld [vmem:[%s2720_s7 + $0x50] ss:$8 sps:$4 sm:$0xff]   ;;  %v343_v54 = vld [vmem:[%s2714_s26 + $0x248] sm:$0xff] }
  0x9e   : > { %1065 = vmatpush1.bf16.msra.mxu1 %v1960_v8  ;;  %1151 = vmatpush1.bf16.msra.mxu0 %v1964_v18  ;;  %v1898_v8 = vcombine.low %v271_v58, %v275_v59  ;;  %v299_v18 = vld [vmem:[%s2714_s26 + $0xe8] sm:$0xff]  ;;  %v321_v43 = vld [vmem:[%s2714_s26 + $0x198] sm:$0xff] }
  0x9f   : > { %1066 = vmatprep.subr.bf16.mxu1 %v1969_v9  ;;  %1152 = vmatprep.subr.bf16.mxu0 %v1973_v21  ;;  %v1907_v9 = vcombine.high %v279_v2, %v283_v3  ;;  %v347_v55 = vld [vmem:[%s2714_s26 + $0x268] sm:$0xff] }
  0xa0   : > { %v351_v58 = vld [vmem:[%s2714_s26 + $0x288] sm:$0xff] }
  0xa1   : > { %v355_v59 = vld [vmem:[%s2714_s26 + $0x2a8] sm:$0xff] }
  0xa2   : > { %1067 = vmatpush1.bf16.msra.mxu1 %v1968_v16  ;;  %1153 = vmatpush1.bf16.msra.mxu0 %v1972_v28  ;;  %v2196_v16 = vld [vmem:[%s2720_s7] ss:$8 sps:$4 sm:$0xff]  }
  0xa3   : > { %1068 = vmatprep.subr.bf16.mxu1 %v1977_v17  ;;  %1154 = vmatprep.subr.bf16.mxu0 %v1981_v31  ;;  %v295_v17 = vld [vmem:[%s2714_s26 + $0xc8] sm:$0xff]  ;;  %v2207_v31 = vld [vmem:[%s2720_s7 + $0x34] ss:$8 sps:$4 sm:$0xff]  }
  0xa4   : > { %v1923_v21 = vcombine.high %v295_v17, %v299_v18  ;;  %v1922_v26 = vcombine.low %v295_v17, %v299_v18  ;;  %v2202_v28 = vld [vmem:[%s2720_s7 + $0x20] ss:$8 sps:$4 sm:$0xff]  }
  0xa5   : > { %v359_v62 = vld [vmem:[%s2714_s26 + $0x2c8] sm:$0xff] }
  0xa6   : > { %1069 = vmatpush1.bf16.msra.mxu1 %v1976_v24  ;;  %1155 = vmatpush1.bf16.msra.mxu0 %v1980_v36  ;;  %v307_v24 = vld [vmem:[%s2714_s26 + $0x128] sm:$0xff] }
  0xa7   : > { %1070 = vmatprep.subr.bf16.mxu1 %v1985_v27  ;;  %1156 = vmatprep.subr.bf16.mxu0 %v1989_v39  ;;  %v1931_v27 = vcombine.high %v303_v23, %v307_v24  ;;  %v323_v36 = vld [vmem:[%s2714_s26 + $0x1a8] sm:$0xff] }
  0xa8   : > { %v363_v63 = vld [vmem:[%s2714_s26 + $0x2e8] sm:$0xff] }
  0xa9   : > { %v367_v2 = vld [vmem:[%s2714_s26 + $0x308] sm:$0xff] }
  0xaa   : > { %1071 = vmatpush1.bf16.msra.mxu1 %v1984_v32  ;;  %1157 = vmatpush1.bf16.msra.mxu0 %v1988_v45  ;;  %v1930_v32 = vcombine.low %v303_v23, %v307_v24  ;;  %v371_v3 = vld [vmem:[%s2714_s26 + $0x328] sm:$0xff]  ;;  %v281_v23 = vld [vmem:[%s2714_s26 + $0x58] sm:$0xff] }
  0xab   : > { %1072 = vmatprep.subr.bf16.mxu1 %v1993_v35  ;;  %1158 = vmatprep.subr.bf16.mxu0 %v1997_v48  ;;  %v319_v35 = vld [vmem:[%s2714_s26 + $0x188] sm:$0xff]  ;;  %v285_v24 = vld [vmem:[%s2714_s26 + $0x78] sm:$0xff] }
  0xac   : > { %v1947_v39 = vcombine.high %v319_v35, %v323_v36  ;;  %v1946_v45 = vcombine.low %v319_v35, %v323_v36  ;;  %v335_v48 = vld [vmem:[%s2714_s26 + $0x208] sm:$0xff]  ;;  %v1910_v29 = vcombine.low %v281_v23, %v285_v24  ;;  %v305_v35 = vld [vmem:[%s2714_s26 + $0x118] sm:$0xff] }
  0xad   : > { %v387_v12 = vld [vmem:[%s2714_s26 + $0x3a8] sm:$0xff]  ;;  %v309_v36 = vld [vmem:[%s2714_s26 + $0x138] sm:$0xff] }
  0xae   : > { %1073 = vmatpush1.bf16.msra.mxu1 %v1992_v40  ;;  %1159 = vmatpush1.bf16.msra.mxu0 %v1996_v53  ;;  %v2208_v40 = vld [vmem:[%s2720_s7 + $0x40] ss:$8 sps:$4 sm:$0xff]   ;;  %v2010_v17 = vcombine.low %v383_v11, %v387_v12 }
  0xaf   : > { %1074 = vmatprep.subr.bf16.mxu1 %v2001_v44  ;;  %1160 = vmatprep.subr.bf16.mxu0 %v2005_v56  ;;  %v2213_v44 = vld [vmem:[%s2720_s7 + $0x54] ss:$8 sps:$4 sm:$0xff]   ;;  %v2214_v53 = vld [vmem:[%s2720_s7 + $0x60] ss:$8 sps:$4 sm:$0xff]  }
  0xb2   : > { %1075 = vmatpush1.bf16.msra.mxu1 %v2000_v49  ;;  %1161 = vmatpush1.bf16.msra.mxu0 %v2004_v61  ;;  %v339_v49 = vld [vmem:[%s2714_s26 + $0x228] sm:$0xff]  ;;  %v1979_v61 = vcombine.high %v351_v58, %v355_v59 }
  0xb3   : > { %1076 = vmatprep.subr.bf16.mxu1 %v2009_v52  ;;  %1162 = vmatprep.subr.bf16.mxu0 %v2013_v0  ;;  %v1963_v52 = vcombine.high %v335_v48, %v339_v49  ;;  %v1962_v56 = vcombine.low %v335_v48, %v339_v49  ;;  %v1978_v0 = vcombine.low %v351_v58, %v355_v59  ;;  %v329_v48 = vld [vmem:[%s2714_s26 + $0x1d8] sm:$0xff] }
  0xb4   : > { %v333_v49 = vld [vmem:[%s2714_s26 + $0x1f8] sm:$0xff] }
  0xb5   : > { %v2225_v59 = vld [vmem:[%s2720_s7 + $0x94] ss:$8 sps:$4 sm:$0xff]  }
  0xb6   : > { %1077 = vmatpush1.bf16.msra.mxu1 %v2008_v57  ;;  %1163 = vmatpush1.bf16.msra.mxu0 %v2012_v6  ;;  %v1971_v57 = vcombine.high %v343_v54, %v347_v55  ;;  %v1995_v6 = vcombine.high %v367_v2, %v371_v3 }
  0xb7   : > { %1078 = vmatprep.subr.bf16.mxu1 %v2017_v60  ;;  %1164 = vmatprep.subr.bf16.mxu0 %v2021_v7  ;;  %v1970_v60 = vcombine.low %v343_v54, %v347_v55  ;;  %v375_v7 = vld [vmem:[%s2714_s26 + $0x348] sm:$0xff]  ;;  %v337_v54 = vld [vmem:[%s2714_s26 + $0x218] sm:$0xff] }
  0xb8   : > { %v341_v55 = vld [vmem:[%s2714_s26 + $0x238] sm:$0xff] }
  0xb9   : > { %v1967_v58 = vcombine.high %v337_v54, %v341_v55 }
  0xba   : > { %1079 = vmatpush1.bf16.msra.mxu1 %v2016_v1  ;;  %1165 = vmatpush1.bf16.msra.mxu0 %v2020_v10  ;;  %v1987_v1 = vcombine.high %v359_v62, %v363_v63 }
  0xbb   : > { %1091 = vmatprep.subr.bf16.mxu1 %v1899_v5  ;;  %1676 = vmatprep.subr.bf16.mxu0 %v2198_v13  ;;  %v1986_v5 = vcombine.low %v359_v62, %v363_v63  ;;  %v2223_v62 = vld [vmem:[%s2720_s7 + $0x90] ss:$8 sps:$4 sm:$0xff]   ;;  %v1966_v63 = vcombine.low %v337_v54, %v341_v55 }
  0xbd   : > { %1081 = vmatmul.mubr.bf16.vlgmr.msra.gmra.mrb[0].mxu1 %v2795_v4  ;;  %1167 = vmatmul.mubr.bf16.vlgmr.msra.gmra.mrb[0].mxu0 %v2795_v4 }
  0xbe   : > { %1092 = vmatpush1.bf16.msra.mxu1 %v1898_v8  ;;  %1123 = vmatprep.mubr.bf16.mxu1 %v2745_v42  ;;  %v379_v8 = vld [vmem:[%s2714_s26 + $0x368] sm:$0xff] }
  0xbf   : > { %1093 = vmatprep.subr.bf16.mxu1 %v1907_v9  ;;  %1677 = vmatpush1.bf16.msra.mxu0 %v2196_v16  ;;  %v1994_v9 = vcombine.low %v367_v2, %v371_v3  ;;  %v2003_v10 = vcombine.high %v375_v7, %v379_v8  ;;  %v2002_v13 = vcombine.low %v375_v7, %v379_v8  ;;  %v395_v16 = vld [vmem:[%s2714_s26 + $0x3e8] sm:$0xff]  ;;  %v353_v2 = vld [vmem:[%s2714_s26 + $0x298] sm:$0xff] }
  0xc0   : > { %1678 = vmatprep.subr.bf16.mxu0 %v2201_v19  ;;  %v273_v19 = vld [vmem:[%s2714_s26 + $0x18] sm:$0xff] }
  0xc1   : > { %v357_v3 = vld [vmem:[%s2714_s26 + $0x2b8] sm:$0xff] }
  0xc2   : > { %1094 = vmatpush1.bf16.msra.mxu1 %v1906_v14  ;;  %v2011_v14 = vcombine.high %v383_v11, %v387_v12  ;;  %v1983_v7 = vcombine.high %v353_v2, %v357_v3  ;;  %v2231_v8 = vld [vmem:[%s2720_s7 + $0xb4] ss:$8 sps:$4 sm:$0xff]   ;;  %v2229_v11 = vld [vmem:[%s2720_s7 + $0xb0] ss:$8 sps:$4 sm:$0xff]   ;;  %v1982_v12 = vcombine.low %v353_v2, %v357_v3 }
  0xc3   : > { %1095 = vmatprep.subr.bf16.mxu1 %v1915_v15  ;;  %1679 = vmatpush1.bf16.msra.mxu0 %v2199_v22  ;;  %v391_v15 = vld [vmem:[%s2714_s26 + $0x3c8] sm:$0xff] }
  0xc4   : > { %1680 = vmatprep.subr.bf16.mxu0 %v2204_v25  ;;  %v2019_v18 = vcombine.high %v391_v15, %v395_v16 }
  0xc6   : > { %1096 = vmatpush1.bf16.msra.mxu1 %v1914_v20  ;;  %v277_v20 = vld [vmem:[%s2714_s26 + $0x38] sm:$0xff] }
  0xc7   : > { %1097 = vmatprep.subr.bf16.mxu1 %v1923_v21  ;;  %1681 = vmatpush1.bf16.msra.mxu0 %v2202_v28  ;;  %v2018_v21 = vcombine.low %v391_v15, %v395_v16  ;;  %v1903_v22 = vcombine.high %v273_v19, %v277_v20  ;;  %v1902_v25 = vcombine.low %v273_v19, %v277_v20  ;;  %v293_v28 = vld [vmem:[%s2714_s26 + $0xb8] sm:$0xff] }
  0xc8   : > { %1682 = vmatprep.subr.bf16.mxu0 %v2207_v31  ;;  %v297_v31 = vld [vmem:[%s2714_s26 + $0xd8] sm:$0xff] }
  0xc9   : > { %v369_v15 = vld [vmem:[%s2714_s26 + $0x318] sm:$0xff] }
  0xca   : > { %1098 = vmatpush1.bf16.msra.mxu1 %v1922_v26  ;;  %v1911_v26 = vcombine.high %v281_v23, %v285_v24  ;;  %v373_v16 = vld [vmem:[%s2714_s26 + $0x338] sm:$0xff] }
  0xcb   : > { %1099 = vmatprep.subr.bf16.mxu1 %v1931_v27  ;;  %1683 = vmatpush1.bf16.msra.mxu0 %v2205_v34  ;;  %v289_v27 = vld [vmem:[%s2714_s26 + $0x98] sm:$0xff]  ;;  %v1999_v19 = vcombine.high %v369_v15, %v373_v16  ;;  %v1998_v24 = vcombine.low %v369_v15, %v373_v16 }
  0xcc   : > { %1684 = vmatprep.subr.bf16.mxu0 %v2210_v37  ;;  %v1919_v30 = vcombine.high %v289_v27, %v293_v28  ;;  %v2237_v20 = vld [vmem:[%s2720_s7 + $0xd4] ss:$8 sps:$4 sm:$0xff]   ;;  %v2235_v23 = vld [vmem:[%s2720_s7 + $0xd0] ss:$8 sps:$4 sm:$0xff]  }
  0xcd   : > { %v2255_v15 = vld [vmem:[%s2720_s7 + $0x134] ss:$8 sps:$4 sm:$0xff]   ;;  %v2253_v16 = vld [vmem:[%s2720_s7 + $0x130] ss:$8 sps:$4 sm:$0xff]  }
  0xce   : > { %1100 = vmatpush1.bf16.msra.mxu1 %v1930_v32  ;;  %v301_v32 = vld [vmem:[%s2714_s26 + $0xf8] sm:$0xff] }
  0xcf   : > { %1101 = vmatprep.subr.bf16.mxu1 %v1939_v33  ;;  %1685 = vmatpush1.bf16.msra.mxu0 %v2208_v40  ;;  %v1918_v33 = vcombine.low %v289_v27, %v293_v28  ;;  %v1927_v34 = vcombine.high %v297_v31, %v301_v32  ;;  %v1926_v37 = vcombine.low %v297_v31, %v301_v32  ;;  %v385_v27 = vld [vmem:[%s2714_s26 + $0x398] sm:$0xff] }
  0xd0   : > { %1686 = vmatprep.subr.bf16.mxu0 %v2213_v44  ;;  %v1934_v40 = vcombine.low %v305_v35, %v309_v36  ;;  %v325_v44 = vld [vmem:[%s2714_s26 + $0x1b8] sm:$0xff] }
  0xd1   : > { %v389_v28 = vld [vmem:[%s2714_s26 + $0x3b8] sm:$0xff] }
  0xd2   : > { %1102 = vmatpush1.bf16.msra.mxu1 %v1938_v38  ;;  %v313_v38 = vld [vmem:[%s2714_s26 + $0x158] sm:$0xff]  ;;  %v2015_v31 = vcombine.high %v385_v27, %v389_v28 }
  0xd3   : > { %1103 = vmatprep.subr.bf16.mxu1 %v1947_v39  ;;  %1687 = vmatpush1.bf16.msra.mxu0 %v2211_v47  ;;  %v317_v39 = vld [vmem:[%s2714_s26 + $0x178] sm:$0xff] }
  0xd4   : > { %1688 = vmatprep.subr.bf16.mxu0 %v2216_v50  ;;  %v1943_v41 = vcombine.high %v313_v38, %v317_v39  ;;  %v2219_v47 = vld [vmem:[%s2720_s7 + $0x74] ss:$8 sps:$4 sm:$0xff]   ;;  %v2217_v50 = vld [vmem:[%s2720_s7 + $0x70] ss:$8 sps:$4 sm:$0xff]  }
  0xd5   : > { %v2243_v32 = vld [vmem:[%s2720_s7 + $0xf4] ss:$8 sps:$4 sm:$0xff]  }
  0xd6   : > { %1104 = vmatpush1.bf16.msra.mxu1 %v1946_v45  ;;  %v1942_v45 = vcombine.low %v313_v38, %v317_v39  ;;  %v2246_v38 = vld [vmem:[%s2720_s7 + $0x104] ss:$8 sps:$4 sm:$0xff]  }
  0xd7   : > { %1105 = vmatprep.subr.bf16.mxu1 %v1955_v46  ;;  %1689 = vmatpush1.bf16.msra.mxu0 %v2214_v53  ;;  %v1951_v46 = vcombine.high %v321_v43, %v325_v44  ;;  %v2222_v53 = vld [vmem:[%s2720_s7 + $0x84] ss:$8 sps:$4 sm:$0xff]  }
  0xd8   : > { %1690 = vmatprep.subr.bf16.mxu0 %v2219_v47 }
  0xda   : > { %1106 = vmatpush1.bf16.msra.mxu1 %v1954_v51  ;;  %v1950_v51 = vcombine.low %v321_v43, %v325_v44 }
  0xdb   : > { %1107 = vmatprep.subr.bf16.mxu1 %v1963_v52  ;;  %1691 = vmatpush1.bf16.msra.mxu0 %v2217_v50  ;;  %v1959_v52 = vcombine.high %v329_v48, %v333_v49 }
  0xdc   : > { %1692 = vmatprep.subr.bf16.mxu0 %v2222_v53 }
  0xde   : > { %1108 = vmatpush1.bf16.msra.mxu1 %v1962_v56  ;;  %v2220_v56 = vld [vmem:[%s2720_s7 + $0x80] ss:$8 sps:$4 sm:$0xff]  }
  0xdf   : > { %1109 = vmatprep.subr.bf16.mxu1 %v1971_v57  ;;  %v1958_v57 = vcombine.low %v329_v48, %v333_v49  ;;  %1693 = vmatpush1.bf16.msra.mxu0 %v2220_v56 }
  0xe0   : > { %1694 = vmatprep.subr.bf16.mxu0 %v2225_v59 }
  0xe2   : > { %1110 = vmatpush1.bf16.msra.mxu1 %v1970_v60  ;;  %v345_v60 = vld [vmem:[%s2714_s26 + $0x258] sm:$0xff] }
  0xe3   : > { %1111 = vmatprep.subr.bf16.mxu1 %v1979_v61  ;;  %v349_v61 = vld [vmem:[%s2714_s26 + $0x278] sm:$0xff]  ;;  %1695 = vmatpush1.bf16.msra.mxu0 %v2223_v62 }
  0xe6   : > { %1112 = vmatpush1.bf16.msra.mxu1 %v1978_v0  ;;  %v1975_v0 = vcombine.high %v345_v60, %v349_v61 }
  0xe7   : > { %1113 = vmatprep.subr.bf16.mxu1 %v1987_v1  ;;  %v2228_v1 = vld [vmem:[%s2720_s7 + $0xa4] ss:$8 sps:$4 sm:$0xff]  }
  0xe8   : > { %1696 = vmatprep.subr.bf16.mxu0 %v2228_v1 }
  0xea   : > { %1114 = vmatpush1.bf16.msra.mxu1 %v1986_v5  ;;  %v2226_v5 = vld [vmem:[%s2720_s7 + $0xa0] ss:$8 sps:$4 sm:$0xff]  }
  0xeb   : > { %1115 = vmatprep.subr.bf16.mxu1 %v1995_v6  ;;  %v1974_v6 = vcombine.low %v345_v60, %v349_v61  ;;  %1697 = vmatpush1.bf16.msra.mxu0 %v2226_v5 }
  0xec   : > { %1698 = vmatprep.subr.bf16.mxu0 %v2231_v8 }
  0xee   : > { %1116 = vmatpush1.bf16.msra.mxu1 %v1994_v9  ;;  %v361_v9 = vld [vmem:[%s2714_s26 + $0x2d8] sm:$0xff] }
  0xef   : > { %1117 = vmatprep.subr.bf16.mxu1 %v2003_v10  ;;  %v365_v10 = vld [vmem:[%s2714_s26 + $0x2f8] sm:$0xff]  ;;  %1699 = vmatpush1.bf16.msra.mxu0 %v2229_v11 }
  0xf0   : > { %v2249_v11 = vld [vmem:[%s2720_s7 + $0x114] ss:$8 sps:$4 sm:$0xff]  }
  0xf2   : > { %1118 = vmatpush1.bf16.msra.mxu1 %v2002_v13  ;;  %v1991_v13 = vcombine.high %v361_v9, %v365_v10 }
  0xf3   : > { %1119 = vmatprep.subr.bf16.mxu1 %v2011_v14  ;;  %v2234_v14 = vld [vmem:[%s2720_s7 + $0xc4] ss:$8 sps:$4 sm:$0xff]  }
  0xf4   : > { %1700 = vmatprep.subr.bf16.mxu0 %v2234_v14  ;;  %v2250_v14 = vld [vmem:[%s2720_s7 + $0x120] ss:$8 sps:$4 sm:$0xff]  }
  0xf6   : > { %1120 = vmatpush1.bf16.msra.mxu1 %v2010_v17  ;;  %v2232_v17 = vld [vmem:[%s2720_s7 + $0xc0] ss:$8 sps:$4 sm:$0xff]  }
  0xf7   : > { %1121 = vmatprep.subr.bf16.mxu1 %v2019_v18  ;;  %v1990_v18 = vcombine.low %v361_v9, %v365_v10  ;;  %1701 = vmatpush1.bf16.msra.mxu0 %v2232_v17  ;;  %v2244_v10 = vld [vmem:[%s2720_s7 + $0x100] ss:$8 sps:$4 sm:$0xff]   ;;  %v2258_v17 = vld [vmem:[%s2720_s7 + $0x144] ss:$8 sps:$4 sm:$0xff]  }
  0xf8   : > { %1702 = vmatprep.subr.bf16.mxu0 %v2237_v20  ;;  %v2259_v20 = vld [vmem:[%s2720_s7 + $0x150] ss:$8 sps:$4 sm:$0xff]  }
  0xfa   : > { %1122 = vmatpush1.bf16.msra.mxu1 %v2018_v21  ;;  %v377_v21 = vld [vmem:[%s2714_s26 + $0x358] sm:$0xff] }
  0xfb   : > { %1177 = vmatprep.subr.bf16.mxu1 %v1903_v22  ;;  %v381_v22 = vld [vmem:[%s2714_s26 + $0x378] sm:$0xff]  ;;  %1703 = vmatpush1.bf16.msra.mxu0 %v2235_v23 }
  0xfc   : > { %v2267_v23 = vld [vmem:[%s2720_s7 + $0x174] ss:$8 sps:$4 sm:$0xff]  }
  0xfd   : > { %1124 = vmatmul.mubr.bf16.vlgmr.msra.gmra.mrb[4].mxu1 %v2795_v4 }
  0xfe   : > { %1178 = vmatpush1.bf16.msra.mxu1 %v1902_v25  ;;  %1209 = vmatprep.mubr.bf16.mxu1 %v2745_v42  ;;  %v1935_v42 = vcombine.high %v305_v35, %v309_v36  ;;  %v2007_v25 = vcombine.high %v377_v21, %v381_v22  ;;  %v2241_v35 = vld [vmem:[%s2720_s7 + $0xf0] ss:$8 sps:$4 sm:$0xff]   ;;  %v2014_v36 = vcombine.low %v385_v27, %v389_v28 }
  0xff   : > { %1179 = vmatprep.subr.bf16.mxu1 %v1911_v26  ;;  %v2240_v26 = vld [vmem:[%s2720_s7 + $0xe4] ss:$8 sps:$4 sm:$0xff]  }
 0x100   : > { %1704 = vmatprep.subr.bf16.mxu0 %v2240_v26 }
 0x102   : > { %1180 = vmatpush1.bf16.msra.mxu1 %v1910_v29  ;;  %v2238_v29 = vld [vmem:[%s2720_s7 + $0xe0] ss:$8 sps:$4 sm:$0xff]  }
 0x103   : > { %1181 = vmatprep.subr.bf16.mxu1 %v1919_v30  ;;  %v2006_v30 = vcombine.low %v377_v21, %v381_v22  ;;  %1705 = vmatpush1.bf16.msra.mxu0 %v2238_v29  ;;  %v2264_v21 = vld [vmem:[%s2720_s7 + $0x164] ss:$8 sps:$4 sm:$0xff]   ;;  %v2262_v22 = vld [vmem:[%s2720_s7 + $0x160] ss:$8 sps:$4 sm:$0xff]  }
 0x104   : > { %1706 = vmatprep.subr.bf16.mxu0 %v2243_v32  ;;  %v2268_v29 = vld [vmem:[%s2720_s7 + $0x180] ss:$8 sps:$4 sm:$0xff]   ;;  %v2271_v32 = vld [vmem:[%s2720_s7 + $0x190] ss:$8 sps:$4 sm:$0xff]  }
 0x106   : > { %1182 = vmatpush1.bf16.msra.mxu1 %v1918_v33  ;;  %v393_v33 = vld [vmem:[%s2714_s26 + $0x3d8] sm:$0xff] }
 0x107   : > { %1183 = vmatprep.subr.bf16.mxu1 %v1927_v34  ;;  %v397_v34 = vld [vmem:[%s2714_s26 + $0x3f8] sm:$0xff]  ;;  %1707 = vmatpush1.bf16.msra.mxu0 %v2241_v35 }
 0x108   : > { %1719 = vmatprep.subr.bf16.mxu0 %v2246_v38  ;;  %v2279_v35 = vld [vmem:[%s2720_s7 + $0x1b4] ss:$8 sps:$4 sm:$0xff]  }
 0x109   : > { %v2285_v38 = vld [vmem:[%s2720_s7 + $0x1d4] ss:$8 sps:$4 sm:$0xff]  }
 0x10a   : > { %1184 = vmatpush1.bf16.msra.mxu1 %v1926_v37  ;;  %v2023_v37 = vcombine.high %v393_v33, %v397_v34 }
 0x10b   : > { %1185 = vmatprep.subr.bf16.mxu1 %v1935_v42  ;;  %v2022_v42 = vcombine.low %v393_v33, %v397_v34  ;;  %v2276_v33 = vld [vmem:[%s2720_s7 + $0x1a4] ss:$8 sps:$4 sm:$0xff]   ;;  %v2274_v34 = vld [vmem:[%s2720_s7 + $0x1a0] ss:$8 sps:$4 sm:$0xff]  }
 0x10e   : > { %1186 = vmatpush1.bf16.msra.mxu1 %v1934_v40 }
 0x10f   : > { %1187 = vmatprep.subr.bf16.mxu1 %v1943_v41 }
 0x112   : > { %1188 = vmatpush1.bf16.msra.mxu1 %v1942_v45 }
 0x113   : > { %1189 = vmatprep.subr.bf16.mxu1 %v1951_v46 }
 0x116   : > { %1190 = vmatpush1.bf16.msra.mxu1 %v1950_v51 }
 0x117   : > { %1191 = vmatprep.subr.bf16.mxu1 %v1959_v52 }
 0x11a   : > { %1192 = vmatpush1.bf16.msra.mxu1 %v1958_v57 }
 0x11b   : > { %1193 = vmatprep.subr.bf16.mxu1 %v1967_v58 }
 0x11e   : > { %1194 = vmatpush1.bf16.msra.mxu1 %v1966_v63 }
 0x11f   : > { %1195 = vmatprep.subr.bf16.mxu1 %v1975_v0 }
 0x122   : > { %1196 = vmatpush1.bf16.msra.mxu1 %v1974_v6 }
 0x123   : > { %1197 = vmatprep.subr.bf16.mxu1 %v1983_v7 }
 0x126   : > { %1198 = vmatpush1.bf16.msra.mxu1 %v1982_v12  ;;  %v2247_v12 = vld [vmem:[%s2720_s7 + $0x110] ss:$8 sps:$4 sm:$0xff]  }
 0x127   : > { %1199 = vmatprep.subr.bf16.mxu1 %v1991_v13  ;;  %v2252_v13 = vld [vmem:[%s2720_s7 + $0x124] ss:$8 sps:$4 sm:$0xff]  }
 0x12a   : > { %1200 = vmatpush1.bf16.msra.mxu1 %v1990_v18  ;;  %v2256_v18 = vld [vmem:[%s2720_s7 + $0x140] ss:$8 sps:$4 sm:$0xff]  }
 0x12b   : > { %1201 = vmatprep.subr.bf16.mxu1 %v1999_v19  ;;  %v2261_v19 = vld [vmem:[%s2720_s7 + $0x154] ss:$8 sps:$4 sm:$0xff]  }
 0x12e   : > { %1202 = vmatpush1.bf16.msra.mxu1 %v1998_v24  ;;  %v2265_v24 = vld [vmem:[%s2720_s7 + $0x170] ss:$8 sps:$4 sm:$0xff]  }
 0x12f   : > { %1203 = vmatprep.subr.bf16.mxu1 %v2007_v25  ;;  %v2270_v25 = vld [vmem:[%s2720_s7 + $0x184] ss:$8 sps:$4 sm:$0xff]  }
 0x132   : > { %1204 = vmatpush1.bf16.msra.mxu1 %v2006_v30 }
 0x133   : > { %1205 = vmatprep.subr.bf16.mxu1 %v2015_v31  ;;  %v2273_v31 = vld [vmem:[%s2720_s7 + $0x194] ss:$8 sps:$4 sm:$0xff]  }
 0x136   : > { %1206 = vmatpush1.bf16.msra.mxu1 %v2014_v36  ;;  %v2277_v36 = vld [vmem:[%s2720_s7 + $0x1b0] ss:$8 sps:$4 sm:$0xff]  }
 0x137   : > { %1207 = vmatprep.subr.bf16.mxu1 %v2023_v37  ;;  %v2282_v37 = vld [vmem:[%s2720_s7 + $0x1c4] ss:$8 sps:$4 sm:$0xff]  }
 0x13a   : > { %1208 = vmatpush1.bf16.msra.mxu1 %v2022_v42  ;;  %v2280_v42 = vld [vmem:[%s2720_s7 + $0x1c0] ss:$8 sps:$4 sm:$0xff]  }
 0x13d   : > { %1210 = vmatmul.mubr.bf16.vlgmr.msra.gmra.mrb[8].mxu1 %v2795_v4 }
 0x190   : > { %v1082_v39 = vpop.f32.mrb[0].mxu1  ;;  %v1168_v48 = vpop.f32.mrb[0].mxu0 }
 0x191   : > { %v2024_v40 = vmul.f32 -1.442695, %v1082_v39  ;;  %v1084_v41 = vpop.f32.mrb[1].mxu1  ;;  %v1170_v49 = vpop.f32.mrb[1].mxu0 }
 0x192   : > { %v2025_v43 = vmul.f32 -1.442695, %v1084_v41  ;;  %v1086_v44 = vpop.f32.mrb[2].mxu1  ;;  %v1172_v50 = vpop.f32.mrb[2].mxu0 }
 0x193   : > { %2292 = vpow2.f32 %v2024_v40  ;;  %v2028_v45 = vmul.f32 -1.442695, %v1086_v44  ;;  %v1088_v46 = vpop.f32.mrb[3].mxu1  ;;  %v1174_v51 = vpop.f32.mrb[3].mxu0  ;;  %v2288_v40 = vld [vmem:[%s2720_s7 + $0x1e4] ss:$8 sps:$4 sm:$0xff]  }
 0x194   : > { %2294 = vpow2.f32 %v2025_v43  ;;  %v2029_v47 = vmul.f32 -1.442695, %v1088_v46  ;;  %v2291_v43 = vld [vmem:[%s2720_s7 + $0x1f4] ss:$8 sps:$4 sm:$0xff]  }
 0x195   : > { %2296 = vpow2.f32 %v2028_v45 }
 0x196   : > { %2298 = vpow2.f32 %v2029_v47 }
 0x19d   : > { %v2293_v52 = vpop.eup %2292 }
 0x19e   : > { %v2295_v4 = vpop.eup %2294  ;;  %v1244_v53 = vadd.f32 1.0, %v2293_v52 }
 0x19f   : > { %v2297_v54 = vpop.eup %2296  ;;  %v1245_v55 = vadd.f32 1.0, %v2295_v4 }
 0x1a0   : > { %v2299_v56 = vpop.eup %2298  ;;  %2300 = vrcp.f32 %v1244_v53  ;;  %v1248_v57 = vadd.f32 1.0, %v2297_v54 }
 0x1a1   : > { %2302 = vrcp.f32 %v1245_v55  ;;  %v1249_v58 = vadd.f32 1.0, %v2299_v56 }
 0x1a2   : > { %2304 = vrcp.f32 %v1248_v57 }
 0x1a3   : > { %2306 = vrcp.f32 %v1249_v58 }
 0x1aa   : > { %v2301_v59 = vpop.eup %2300 }
 0x1ab   : > { %v2303_v60 = vpop.eup %2302  ;;  %v1268_v61 = vmul.f32 %v2301_v59, %v1082_v39  ;;  %v2283_v39 = vld [vmem:[%s2720_s7 + $0x1d0] ss:$8 sps:$4 sm:$0xff]  }
 0x1ac   : > { %v2305_v62 = vpop.eup %2304  ;;  %v1269_v63 = vmul.f32 %v2303_v60, %v1084_v41  ;;  %v2286_v41 = vld [vmem:[%s2720_s7 + $0x1e0] ss:$8 sps:$4 sm:$0xff]  }
 0x1ad   : > { %v2307_v0 = vpop.eup %2306  ;;  %v1272_v1 = vmul.f32 %v2305_v62, %v1086_v44  ;;  %v1276_v2 = vmul.f32 %v1268_v61, %v1168_v48 }
 0x1ae   : > { %v1273_v3 = vmul.f32 %v2307_v0, %v1088_v46  ;;  %v1277_v5 = vmul.f32 %v1269_v63, %v1170_v49  ;;  %v2289_v46 = vld [vmem:[%s2720_s7 + $0x1f0] ss:$8 sps:$4 sm:$0xff]  }
 0x1af   : > { %v1280_v6 = vmul.f32 %v1272_v1, %v1172_v50 }
 0x1b0   : > { %v1281_v7 = vmul.f32 %v1273_v3, %v1174_v51 }
 0x1b1   : > { %v1288_v8 = vpack.c.bf16 %v1280_v6, %v1276_v2 }
 0x1b2   : > { %v1289_v9 = vpack.c.bf16 %v1281_v7, %v1277_v5 }
 0x1b4   : > { %1708 = vmatprep.mubr.bf16.mxu0 %v1289_v9 }
 0x1b5   : > { %1709 = vmatmul.mubr.bf16.vlgmr.msra.gmra.mrb[4].mxu0 %v1288_v8 }
 0x1b6   : > { %1720 = vmatpush1.bf16.msra.mxu0 %v2244_v10 }
 0x1b7   : > { %1721 = vmatprep.subr.bf16.mxu0 %v2249_v11  ;;  %v1284_v11 = vld [vmem:[#allocation8] sm:$0xff] }
 0x1ba   : > { %1722 = vmatpush1.bf16.msra.mxu0 %v2247_v12  ;;  %v1285_v12 = vld [vmem:[#allocation8 + $0x8] sm:$0xff] }
 0x1bb   : > { %1723 = vmatprep.subr.bf16.mxu0 %v2252_v13 }
 0x1be   : > { %1724 = vmatpush1.bf16.msra.mxu0 %v2250_v14  ;;  %v1286_v14 = vld [vmem:[#allocation8 + $0x10] sm:$0xff] }
 0x1bf   : > { %1725 = vmatprep.subr.bf16.mxu0 %v2255_v15 }
 0x1c2   : > { %1726 = vmatpush1.bf16.msra.mxu0 %v2253_v16 }
 0x1c3   : > { %1727 = vmatprep.subr.bf16.mxu0 %v2258_v17  ;;  %v1287_v17 = vld [vmem:[#allocation8 + $0x18] sm:$0xff] }
 0x1c6   : > { %1728 = vmatpush1.bf16.msra.mxu0 %v2256_v18 }
 0x1c7   : > { %1729 = vmatprep.subr.bf16.mxu0 %v2261_v19 }
 0x1ca   : > { %1730 = vmatpush1.bf16.msra.mxu0 %v2259_v20 }
 0x1cb   : > { %1731 = vmatprep.subr.bf16.mxu0 %v2264_v21 }
 0x1ce   : > { %1732 = vmatpush1.bf16.msra.mxu0 %v2262_v22 }
 0x1cf   : > { %1733 = vmatprep.subr.bf16.mxu0 %v2267_v23 }
 0x1d0   : > { %v1125_v26 = vpop.f32.mrb[4].mxu1 }
 0x1d1   : > { %v1127_v27 = vpop.f32.mrb[5].mxu1  ;;  %v2026_v44 = vmul.f32 -1.442695, %v1125_v26 }
 0x1d2   : > { %v1129_v28 = vpop.f32.mrb[6].mxu1  ;;  %1734 = vmatpush1.bf16.msra.mxu0 %v2265_v24  ;;  %v2027_v45 = vmul.f32 -1.442695, %v1127_v27 }
 0x1d3   : > { %v1131_v30 = vpop.f32.mrb[7].mxu1  ;;  %1735 = vmatprep.subr.bf16.mxu0 %v2270_v25  ;;  %v2030_v47 = vmul.f32 -1.442695, %v1129_v28  ;;  %2308 = vpow2.f32 %v2026_v44 }
 0x1d4   : > { %v2031_v48 = vmul.f32 -1.442695, %v1131_v30  ;;  %2310 = vpow2.f32 %v2027_v45 }
 0x1d5   : > { %2312 = vpow2.f32 %v2030_v47 }
 0x1d6   : > { %1736 = vmatpush1.bf16.msra.mxu0 %v2268_v29  ;;  %2314 = vpow2.f32 %v2031_v48 }
 0x1d7   : > { %1737 = vmatprep.subr.bf16.mxu0 %v2273_v31 }
 0x1da   : > { %1738 = vmatpush1.bf16.msra.mxu0 %v2271_v32 }
 0x1db   : > { %1739 = vmatprep.subr.bf16.mxu0 %v2276_v33 }
 0x1dd   : > { %v2309_v49 = vpop.eup %2308 }
 0x1de   : > { %1740 = vmatpush1.bf16.msra.mxu0 %v2274_v34  ;;  %v2311_v50 = vpop.eup %2310  ;;  %v1246_v4 = vadd.f32 1.0, %v2309_v49 }
 0x1df   : > { %1741 = vmatprep.subr.bf16.mxu0 %v2279_v35  ;;  %v2313_v51 = vpop.eup %2312  ;;  %v1247_v53 = vadd.f32 1.0, %v2311_v50 }
 0x1e0   : > { %v2315_v52 = vpop.eup %2314  ;;  %v1250_v54 = vadd.f32 1.0, %v2313_v51  ;;  %2316 = vrcp.f32 %v1246_v4 }
 0x1e1   : > { %v1251_v55 = vadd.f32 1.0, %v2315_v52  ;;  %2318 = vrcp.f32 %v1247_v53 }
 0x1e2   : > { %1742 = vmatpush1.bf16.msra.mxu0 %v2277_v36  ;;  %2320 = vrcp.f32 %v1250_v54 }
 0x1e3   : > { %1743 = vmatprep.subr.bf16.mxu0 %v2282_v37  ;;  %2322 = vrcp.f32 %v1251_v55 }
 0x1e6   : > { %1744 = vmatpush1.bf16.msra.mxu0 %v2280_v42 }
 0x1e7   : > { %1745 = vmatprep.subr.bf16.mxu0 %v2285_v38 }
 0x1ea   : > { %1746 = vmatpush1.bf16.msra.mxu0 %v2283_v39  ;;  %v2317_v56 = vpop.eup %2316 }
 0x1eb   : > { %1747 = vmatprep.subr.bf16.mxu0 %v2288_v40  ;;  %v2319_v57 = vpop.eup %2318  ;;  %v1270_v60 = vmul.f32 %v2317_v56, %v1125_v26 }
 0x1ec   : > { %v2321_v58 = vpop.eup %2320  ;;  %v1271_v61 = vmul.f32 %v2319_v57, %v1127_v27 }
 0x1ed   : > { %v2323_v59 = vpop.eup %2322  ;;  %v1274_v63 = vmul.f32 %v2321_v58, %v1129_v28 }
 0x1ee   : > { %1748 = vmatpush1.bf16.msra.mxu0 %v2286_v41  ;;  %v1275_v2 = vmul.f32 %v2323_v59, %v1131_v30 }
 0x1ef   : > { %1749 = vmatprep.subr.bf16.mxu0 %v2291_v43 }
 0x1f2   : > { %1750 = vmatpush1.bf16.msra.mxu0 %v2289_v46 }
 0x210   : > { %v1211_v62 = vpop.f32.mrb[8].mxu1 }
 0x211   : > { %v1278_v0 = vmul.f32 %v1270_v60, %v1211_v62  ;;  %v1213_v1 = vpop.f32.mrb[9].mxu1 }
 0x212   : > { %v1279_v3 = vmul.f32 %v1271_v61, %v1213_v1  ;;  %v1215_v5 = vpop.f32.mrb[10].mxu1 }
 0x213   : > { %v1282_v6 = vmul.f32 %v1274_v63, %v1215_v5  ;;  %v1217_v7 = vpop.f32.mrb[11].mxu1 }
 0x214   : > { %v1283_v8 = vmul.f32 %v1275_v2, %v1217_v7 }
 0x215   : > { %v1290_v9 = vpack.c.bf16 %v1282_v6, %v1278_v0 }
 0x216   : > { %v1291_v10 = vpack.c.bf16 %v1283_v8, %v1279_v3 }
 0x218   : > { %1751 = vmatprep.mubr.bf16.mxu0 %v1291_v10 }
 0x219   : > { %1752 = vmatmul.mubr.bf16.vlgmr.msra.gmra.mrb[4].mxu0 %v1290_v9 }
 0x2ec   : > { %v1753_v13 = vpop.f32.mrb[4].mxu0 }
 0x2ed   : > { %v1762_v15 = vadd.f32 %v1753_v13, %v1284_v11  ;;  %v1755_v16 = vpop.f32.mrb[5].mxu0 }
 0x2ee   : > { %v1763_v18 = vadd.f32 %v1755_v16, %v1285_v12  ;;  %v1757_v19 = vpop.f32.mrb[6].mxu0 }
 0x2ef   : > { %1766 = vst [vmem:[#allocation8] sm:$0xff] %v1762_v15  ;;  %v1764_v20 = vadd.f32 %v1757_v19, %v1286_v14  ;;  %v1759_v21 = vpop.f32.mrb[7].mxu0 }
 0x2f0   : > { %1767 = vst [vmem:[#allocation8 + $0x8] sm:$0xff] %v1763_v18  ;;  %v1765_v22 = vadd.f32 %v1759_v21, %v1287_v17 }
 0x2f1   : > { %1768 = vst [vmem:[#allocation8 + $0x10] sm:$0xff] %v1764_v20 }
 0x2f2   : > { %1769 = vst [vmem:[#allocation8 + $0x18] sm:$0xff] %v1765_v22 }
 0x2f3   : > { %2425 = shalt.err (!%p2422_p7)
}
 0x2f4   : > { %s2426_s11 = scalar_lea.hbm %s2971_s3, 512 }
 0x2f5   : > { %p2427_p9 = scmp.ne.s32.totalorder %s2971_s3, %s2426_s11  ;;  %p2432_p12 = scmp.lt.u32.totalorder %s2426_s11, %s2971_s3 }
 0x2f7   : > { %p2428_p3 = pnand %p2427_p9, %p2133_p0 }
 0x2f9   : > { %p2429_p11 = pneg %p2428_p3 }
 0x2fb   : > { %p2434_p10 = pnand %p2432_p12, %p2429_p11 }
 0x2fd   : > { %2437 = shalt.err (!%p2434_p10)
}
 0x2fe   : > { %s2508_s9 = smov 256   ;;  %s2509_s12 = smov 16  }
 0x2ff   : > { %2116 = dma.vmem_to_hbm [thread:$0]  (%p2133_p0), %s1781_s6, 512, %s2971_s3, [#allocation4], %s2508_s9, %s2508_s9, %s2509_s12  }
 0x300   : > { %2471 = dma.done.wait (%p2133_p0), [#allocation4], 512  }
 0x301   : > { %2473 = vsyncadd (%p2133_p0), [#allocation4], 4294966784 }
 0x302 PF: > { %s18_s17 = sadd.s32 1, %s2496_s17   ;;  %s2989_s12 = smov %s2480_s13 }
 0x303   : > { %p15_p6 = scmp.ge.s32.totalorder %s18_s17, 4   ;;  %s2990_s13 = smov %s2484_s14 }
 0x304   : > { %s2991_s14 = smov %s2574_s24  ;;  %s2992_s15 = smov %s2492_s16 }
 0x305   : > { %s2993_s16 = smov %s2995_s18  ;;  %17 = sbr.rel (!%p15_p6) target bundleno = 6 (0x6), region = 91 }
 0x30c   :  { %1796 = vsyncpa [#allocation3], 1 }
 0x30d   :  { %1798 = vsyncpa [#allocation3 + $0x1], 1 }
 0x30e   :  { %1799 = vsyncpa [#allocation6], 1 }
 0x30f   :  { %1801 = vsyncpa [#allocation6 + $0x1], 1 }
 0x310   :  { %1802 = vsyncpa [#allocation4], 1 }
 0x311   :  { %1804 = vsyncpa [#allocation4 + $0x1], 1 }

</bundles_post_ra>
